<compile_context>
chip_gen: v5e
topology: v5e:2x2
jax: 0.10.0
libtpu: 0.0.40
codegen_flags: <defaults>
</compile_context>

<pallas_src>
import jax
import jax.numpy as jnp
from jax.experimental import pallas as pl
from jax.experimental.pallas import tpu as pltpu


def _embed_kernel(x_ref, pe_ref, o_ref):
    # x_ref:  (tseq, d_model)  one batch row's sequence tile
    # pe_ref: (tseq, d_model)  matching slice of the learned positional table
    # o_ref:  (tseq, d_model)
    o_ref[...] = x_ref[...] + pe_ref[...]
    # TODO(synk): training-mode dropout (pltpu.prng_random_bits mask + scale)
    # is omitted; eval-mode dropout is the identity, matching inference.


def _choose_seq_tile(seq, d_model, itemsize):
    """Largest sublane-aligned tile dividing seq that fits the VMEM budget."""
    # Sub-32-bit dtypes pack along sublanes: 8 rows for f32, 16 bf16, 32 int8.
    sub = 8 * max(1, 4 // max(1, itemsize))
    if seq % sub != 0:
        # Full-extent block (block == full dim is always legal); rare path.
        return seq
    # Budget: 3 arrays (x, pe, out) x 2 pipeline buffers x block bytes, kept
    # well under the 32 MiB scoped-VMEM default (v7x) without raising limits.
    budget = 24 * 1024 * 1024
    max_rows = max(sub, (budget // (6 * d_model * itemsize)) // sub * sub)
    best = sub
    t = sub
    limit = min(seq, max_rows)
    while t <= limit:
        if seq % t == 0:
            best = t
        t += sub
    return best


def bert_embedding3(sequence, pe, *, tseq=None):
    """sequence: (batch, seq, d_model); pe: (max_len, d_model) learned table."""
    batch, seq, d_model = sequence.shape
    assert pe.shape[0] >= seq and pe.shape[1] == d_model

    itemsize = jnp.dtype(sequence.dtype).itemsize
    if tseq is None:
        tseq = _choose_seq_tile(seq, d_model, itemsize)

    # Pass the full pe table and let the BlockSpec index it directly when the
    # tiles are aligned and no dtype cast is needed (saves an XLA slice/copy).
    # Otherwise materialize a sliced, pre-cast copy once in the wrapper.
    aligned = (seq % tseq == 0) and (tseq % 8 == 0)
    if pe.dtype == sequence.dtype and aligned:
        pe_in = pe
    else:
        pe_in = pe[:seq, :].astype(sequence.dtype)

    # Batch innermost: pe block index (j, 0) is constant across batch steps,
    # so its tile is not re-fetched from HBM per batch row.
    grid = (pl.cdiv(seq, tseq), batch)

    pe_itemsize = jnp.dtype(pe_in.dtype).itemsize
    cost = pl.CostEstimate(
        flops=batch * seq * d_model,
        transcendentals=0,
        # x read + out write + pe read once (matches post-reorder traffic).
        bytes_accessed=2 * batch * seq * d_model * itemsize
        + seq * d_model * pe_itemsize,
    )

    out = pl.pallas_call(
        _embed_kernel,
        out_shape=jax.ShapeDtypeStruct((batch, seq, d_model), sequence.dtype),
        grid_spec=pltpu.PrefetchScalarGridSpec(
            num_scalar_prefetch=0,
            grid=grid,
            in_specs=[
                # batch dim squeezed out of the kernel view.
                pl.BlockSpec((None, tseq, d_model), lambda j, b: (b, j, 0)),
                # positional tile: independent of the (inner) batch index, so
                # the pipeline reuses the resident tile instead of re-DMAing.
                pl.BlockSpec((tseq, d_model), lambda j, b: (j, 0)),
            ],
            out_specs=pl.BlockSpec((None, tseq, d_model), lambda j, b: (b, j, 0)),
        ),
        compiler_params=pltpu.CompilerParams(
            dimension_semantics=("parallel", "parallel"),
        ),
        cost_estimate=cost,
    )(sequence, pe_in)

    return out


def _reference(sequence, pe):
    seq = sequence.shape[1]
    return sequence + pe[None, :seq, :].astype(sequence.dtype)


if __name__ == "__main__":
    batch, seq, d_model, max_len = 2, 8, 32, 512

    key = jax.random.PRNGKey(0)
    kx, kpe = jax.random.split(key, 2)

    sequence = jax.random.normal(kx, (batch, seq, d_model), dtype=jnp.float32)
    # LearnedPositionalEmbedding: normal init with std = d_model ** -0.5.
    pe = (jax.random.normal(kpe, (max_len, d_model), dtype=jnp.float32)
          * (d_model ** -0.5))

    out = bert_embedding3(sequence, pe)
    out = jax.block_until_ready(out)

    ref = _reference(sequence, pe)
    assert out.shape == (batch, seq, d_model)
    assert jnp.allclose(out, ref, atol=1e-6, rtol=1e-6), "mismatch vs reference"

    print("KERNEL_OK")
</pallas_src>

<mosaic_0001>
module attributes {stable_mosaic.version = 11 : i64} {
  func.func @_embed_kernel(%arg0: i32, %arg1: i32, %arg2: memref<1x8x32xf32, #tpu.memory_space<vmem>>, %arg3: memref<8x32xf32, #tpu.memory_space<vmem>>, %arg4: memref<1x8x32xf32, #tpu.memory_space<vmem>>) attributes {dimension_semantics = [#tpu.dimension_semantics<parallel>, #tpu.dimension_semantics<parallel>], iteration_bounds = array<i64: 1, 2>, scalar_prefetch = 0 : i64, scratch_operands = 0 : i64, tpu.core_type = #tpu.core_type<tc>, window_params = [{transform_indices = @transform_0, window_bounds = array<i64: 1, 8, 32>}, {transform_indices = @transform_1, window_bounds = array<i64: 8, 32>}, {transform_indices = @transform_2, window_bounds = array<i64: 1, 8, 32>}]} {
    %c0 = arith.constant 0 : index
    %c0_0 = arith.constant 0 : index
    %c0_1 = arith.constant 0 : index
    %0 = vector.load %arg2[%c0, %c0_0, %c0_1] : memref<1x8x32xf32, #tpu.memory_space<vmem>>, vector<1x8x32xf32>
    %1 = vector.shape_cast %0 : vector<1x8x32xf32> to vector<8x32xf32>
    %c0_2 = arith.constant 0 : index
    %c0_3 = arith.constant 0 : index
    %2 = vector.load %arg3[%c0_2, %c0_3] : memref<8x32xf32, #tpu.memory_space<vmem>>, vector<8x32xf32>
    %3 = arith.addf %1, %2 : vector<8x32xf32>
    %c0_4 = arith.constant 0 : index
    %c0_5 = arith.constant 0 : index
    %c0_6 = arith.constant 0 : index
    %4 = vector.load %arg4[%c0_4, %c0_5, %c0_6] : memref<1x8x32xf32, #tpu.memory_space<vmem>>, vector<1x8x32xf32>
    %5 = vector.shape_cast %4 : vector<1x8x32xf32> to vector<8x32xf32>
    %6 = vector.shape_cast %3 : vector<8x32xf32> to vector<1x8x32xf32>
    tpu.vector_store %arg4[%c0_4, %c0_5, %c0_6], %6 {strides = array<i32>} : memref<1x8x32xf32, #tpu.memory_space<vmem>>, vector<1x8x32xf32>,
    return
  }
  func.func @transform_0(%arg0: i32, %arg1: i32) -> (i32, i32, i32) {
    %c0_i32 = arith.constant 0 : i32
    %c0_i32_0 = arith.constant 0 : i32
    return %arg1, %arg0, %c0_i32 : i32, i32, i32
  }
  func.func @transform_1(%arg0: i32, %arg1: i32) -> (i32, i32) {
    %c0_i32 = arith.constant 0 : i32
    %c0_i32_0 = arith.constant 0 : i32
    return %arg0, %c0_i32 : i32, i32
  }
  func.func @transform_2(%arg0: i32, %arg1: i32) -> (i32, i32, i32) {
    %c0_i32 = arith.constant 0 : i32
    %c0_i32_0 = arith.constant 0 : i32
    return %arg1, %arg0, %c0_i32 : i32, i32, i32
  }
}

</mosaic_0001>

<bundles_post_ra>
// kernel: tpu_custom_call.1
= control target key start
LH: loop header
LB: loop body
LE: loop exit
PB: predicated region body
PF: predicated region fallthrough
CT: control target
= control target key end

     0   :  { %7 = vsyncpa [#allocation3], 0  ;;  %s546_s0 = inlined_call_operand.vmem [shape: f32[2,8,32], index: 0, kind: input, shape index: {}]   ;;  %s547_s1 = inlined_call_operand.vmem [shape: f32[512,32], index: 1, kind: input, shape index: {}]   ;;  %s548_s2 = inlined_call_operand.hbm [shape: f32[2,8,32], index: 2, kind: output, shape index: {}]  }
   0x1   :  { %9 = vsyncpa [#allocation3 + $0x1], 0  ;;  %s451_s9 = smov 0   ;;  %s453_s10 = smov 0  }
   0x2   :  { %s455_s11 = smov 0   ;;  %s457_s12 = smov 0  }
   0x3   :  { %s459_s13 = smov 0   ;;  %s461_s14 = smov 0  }
   0x4 LB: > { %s289_s15 = sadd.s32 4294967295, %s434_s14   ;;  %s290_s16 = sadd.s32 4294967294, %s434_s14   ;;  %s434_s14 = sphi %s461_s14, %s15_s14   ;;  %s430_s13 = sphi %s459_s13, %s555_s13   ;;  %s426_s12 = sphi %s457_s12, %s554_s12   ;;  %s422_s11 = sphi %s455_s11, %s553_s11   ;;  %s418_s10 = sphi %s453_s10, %s552_s10   ;;  %s414_s9 = sphi %s451_s9, %s551_s9  }
   0x5   : > { %s24_s17 = sadd.s32 1, %s430_s13  ;;  %s90_s18 = sadd.s32 1, %s422_s11 }
   0x6   : > { %p25_p0 = scmp.ge.s32.totalorder %s24_s17, 2  ;;  %p100_p1 = scmp.ne.s32.totalorder %s422_s11, %s418_s10 }
   0x7   : > { %p101_p2 = scmp.eq.s32.totalorder %s289_s15, 1  ;;  %p106_p3 = scmp.ne.s32.totalorder %s418_s10, %s414_s9 }
   0x8   : > { %s557_s17 = smov (%p25_p0, %s24_s17), 0  ;;  %p107_p5 = scmp.eq.s32.totalorder %s290_s16, 1 }
   0x9   : > { %p489_p4 = por %p101_p2, %p100_p1  ;;  %s85_s20 = ssub.s32 %s430_s13, %s557_s17 }
   0xa   : > { %p294_p6 = scmp.ge.s32.totalorder %s434_s14, 1  ;;  %p88_p7 = scmp.eq.s32.totalorder %s85_s20, 0 }
   0xb   : > { %p496_p8 = por %p107_p5, %p106_p3  ;;  %p142_p9 = scmp.lt.s32.totalorder %s434_s14, 3 }
   0xc   : > { %s502_s22 = scalar_select %p88_p7, %s422_s11, %s90_s18  }
   0xd   : > { %p143_p10 = pnand %p294_p6, %p142_p9 }
   0xe   : > { %s167_s23 = sand.u32 (!%p143_p10), 1, %s418_s10   ;;  %p170_p11 = scmp.lt.s32.totalorder (!%p143_p10), %s426_s12, 1 }
   0xf   : > { %146 = sbr.rel (%p143_p10) target bundleno = 33 (0x21), region = 28  ;;  %s295_s24 = sshll.u32 (!%p143_p10), %s167_s23, 3 }
  0x10   : > { %s298_s25 = sshll.u32 (!%p143_p10), %s426_s12, 3  ;;  %s169_s4 = scalar_lea.vmem (!%p143_p10), [#allocation2], %s295_s24 }
  0x11   : > { %s198_s28 = scalar_lea.hbm (!%p143_p10), %s548_s2, %s298_s25  ;;  %s200_s5 = sshll.u32 (!%p143_p10), %s169_s4, 4  ;;  %s201_s5 = int_to_ptr.vmem [resolvable:$true] %s200_s5 }
  0x12   : > { %s202_s15 = sshll.u32 (!%p143_p10), %s198_s28, 4  ;;  %s187_s16 = scalar_lea.sflag (!%p143_p10), [#allocation3], %s167_s23  ;;  %s203_s15 = int_to_ptr.hbm [resolvable:$true] %s202_s15 }
  0x13   : > { %s376_s25 = scalar_lea.hbm (!%p143_p10), %s548_s2, 16 }
  0x14   : > { %s559_s12 = smov (!%p170_p11, %s426_s12), 1  ;;  %v182_v0 = vld [vmem:[%s547_s1] sm:$0xff]  ;;  %vm184_vm0 = vcmask 261120  }
  0x15   : > { %s296_s29 = sshll.u32 %s559_s12, 3  ;;  %s370_s12 = sshra.s32 %s203_s15, 4  ;;  %s371_s12 = int_to_ptr.hbm [resolvable:$true] %s370_s12 }
  0x16   : > { %s176_s8 = scalar_lea.vmem %s546_s0, %s296_s29  ;;  %s372_s18 = scalar_lea.hbm %s371_s12, 8 }
  0x17   : > { %v181_v1 = vld [vmem:[%s176_s8] sm:$0xff]  ;;  %p373_p12 = scmp.ne.s32.totalorder %s371_s12, %s372_s18  ;;  %p377_p1 = scmp.lt.s32.totalorder %s371_s12, %s548_s2 }
  0x18   : > { %v183_v2 = vadd.f32 %v182_v0, %v181_v1  ;;  %p378_p2 = scmp.lt.s32.totalorder %s376_s25, %s372_s18 }
  0x19   : > { %p374_p13 = pnand %p373_p12, %p489_p4 }
  0x1a   : > { %185 = vst.msk [vmem:[%s169_s4] sm:$0xff] %vm184_vm0, %v183_v2  ;;  %p379_p3 = por %p378_p2, %p377_p1 }
  0x1b   : > { %p375_p0 = pneg %p374_p13 }
  0x1d   : > { %p380_p5 = pnand %p379_p3, %p375_p0 }
  0x1f   : > { %383 = shalt.err (!%p380_p5)
}
  0x20   : > { %301 = dma.vmem_to_hbm [thread:$0]  (%p489_p4), %s201_s5, 128, %s203_s15, %s187_s16  }
  0x21 PF: > { %p307_p6 = scmp.ge.s32.totalorder %s434_s14, 2  ;;  %s214_s23 = sand.u32 1, %s414_s9  }
  0x22   : > { %s215_s28 = scalar_lea.sflag [#allocation3], %s214_s23 }
  0x23   : > { %p304_p7 = pnand %p307_p6, %p496_p8 }
  0x25   : > { %p305_p9 = pneg %p304_p7 }
  0x27   : > { %409 = dma.done.wait (%p305_p9), %s215_s28, 128  }
  0x28   : > { %411 = vsyncadd (%p305_p9), %s215_s28, 4294967168  ;;  %s15_s14 = sadd.s32 1, %s434_s14   ;;  %s551_s9 = smov %s418_s10 }
  0x29   : > { %p12_p10 = scmp.ge.s32.totalorder %s15_s14, 4   ;;  %s552_s10 = smov %s422_s11 }
  0x2a   : > { %s553_s11 = smov %s502_s22  ;;  %s554_s12 = smov %s430_s13 }
  0x2b   : > { %s555_s13 = smov %s557_s17  ;;  %14 = sbr.rel (!%p12_p10) target bundleno = 4 (0x4), region = 66 }
  0x30   :  { %221 = vsyncpa [#allocation3], 1 }
  0x31   :  { %223 = vsyncpa [#allocation3 + $0x1], 1 }

</bundles_post_ra>
